<compile_context>
chip_gen: v7x
topology: tpu7x:2x2x1
jax: 0.10.0
libtpu: 0.0.40
codegen_flags: <defaults>
</compile_context>

<pallas_src>
import functools

import jax
import jax.numpy as jnp
from jax import lax
from jax.experimental import pallas as pl
from jax.experimental.pallas import tpu as pltpu


def _layernorm_kernel(x_ref, g_ref, o_ref, *, eps, inv_c):
    # x_ref: (bb, C, ts) block; g_ref: (1, C, 1); o_ref: (bb, C, ts).
    x = x_ref[...].astype(jnp.float32)
    mean = jnp.sum(x, axis=1, keepdims=True) * inv_c                    # (bb, 1, ts)
    centered = x - mean
    var = jnp.sum(centered * centered, axis=1, keepdims=True) * inv_c   # unbiased=False
    out = centered * lax.rsqrt(var + eps) * g_ref[...].astype(jnp.float32)
    o_ref[...] = out.astype(o_ref.dtype)


def _cdiv(a, b):
    return (a + b - 1) // b


def _vmem_capacity_bytes():
    try:
        info = pltpu.get_tpu_info()
        cap = getattr(info, "vmem_capacity_bytes", None)
        if cap:
            return int(cap)
    except Exception:
        pass
    return 64 << 20  # conservative fallback: v7x per-TensorCore VMEM


def _choose_tiles(B, C, S, dtype):
    """Pick (bb, ts, vmem_limit): batch block, lane tile, scoped-VMEM limit."""
    itemsize = jnp.dtype(dtype).itemsize
    # Sublane packing: 8 rows per 32-bit vreg; sub-32-bit dtypes pack more rows.
    pack = 8 * max(1, 4 // itemsize)
    c_pad = _cdiv(C, pack) * pack                # real sublane footprint of C
    s_pad128 = _cdiv(S, 128) * 128

    cap = _vmem_capacity_bytes()
    # Budget for the pipelined working set: half of per-core VMEM (<= 64 MiB).
    budget = min(cap // 2, 64 << 20)

    # Per-block-element VMEM footprint:
    #   double-buffered input + output in native dtype (2 + 2 copies) plus
    #   ~3 full-tile f32 temporaries inside the kernel (x upcast, centered, out).
    per_elem = 4 * itemsize + 3 * 4
    max_elems = max(budget // per_elem, 128 * pack)

    # Widest lane tile (multiple of 128) for a single batch row.
    ts = (max_elems // c_pad) // 128 * 128
    ts = max(128, min(ts, s_pad128))

    # If a whole row fits, block multiple batch rows per grid step instead.
    bb = 1
    if ts >= s_pad128:
        ts = s_pad128
        bb = max(1, min(B, max_elems // (c_pad * ts)))

    # Keep at least 2 independent blocks so both v7x TensorCores get work.
    if _cdiv(B, bb) * _cdiv(S, ts) < 2:
        if B >= 2:
            bb = _cdiv(B, 2)
        elif s_pad128 > 128:
            ts = max(128, _cdiv(_cdiv(s_pad128, 2), 128) * 128)

    vmem_limit = int(min(cap - (8 << 20), budget + (16 << 20)))
    return bb, ts, vmem_limit


def layer_norm(x, g):
    """x: (B, C, H, W), g: (1, C, 1, 1). Returns (B, C, H, W)."""
    B, C, H, W = x.shape
    S = H * W
    eps = 1e-5 if x.dtype == jnp.float32 else 1e-3

    x_flat = x.reshape(B, C, S)
    g_flat = g.reshape(1, C, 1)

    bb, ts, vmem_limit = _choose_tiles(B, C, S, x.dtype)
    grid = (_cdiv(B, bb), _cdiv(S, ts))

    kernel = functools.partial(_layernorm_kernel, eps=eps, inv_c=1.0 / C)

    out_flat = pl.pallas_call(
        kernel,
        out_shape=jax.ShapeDtypeStruct((B, C, S), x.dtype),
        grid_spec=pltpu.PrefetchScalarGridSpec(
            num_scalar_prefetch=0,
            grid=grid,
            in_specs=[
                pl.BlockSpec((bb, C, ts), lambda b, s: (b, 0, s)),
                pl.BlockSpec((1, C, 1), lambda b, s: (0, 0, 0)),
            ],
            out_specs=pl.BlockSpec((bb, C, ts), lambda b, s: (b, 0, s)),
        ),
        compiler_params=pltpu.CompilerParams(
            dimension_semantics=("parallel", "parallel"),
            vmem_limit_bytes=vmem_limit,
        ),
    )(x_flat, g_flat)

    return out_flat.reshape(B, C, H, W)


def layer_norm_ref(x, g):
    eps = 1e-5 if x.dtype == jnp.float32 else 1e-3
    xf = x.astype(jnp.float32)
    mean = jnp.mean(xf, axis=1, keepdims=True)
    var = jnp.mean((xf - mean) ** 2, axis=1, keepdims=True)
    out = (xf - mean) * lax.rsqrt(var + eps) * g.astype(jnp.float32)
    return out.astype(x.dtype)


if __name__ == "__main__":
    key = jax.random.PRNGKey(0)
    B, C, H, W = 2, 4, 16, 16
    x = jax.random.normal(key, (B, C, H, W), dtype=jnp.float32)
    # Deterministic parameter init, matching nn.Parameter(torch.ones(1, dim, 1, 1)).
    g = jnp.ones((1, C, 1, 1), dtype=jnp.float32)

    out = layer_norm(x, g)
    jax.block_until_ready(out)

    ref = layer_norm_ref(x, g)
    assert out.shape == (B, C, H, W)
    assert jnp.allclose(out, ref, atol=1e-5, rtol=1e-5)

    print("KERNEL_OK")
</pallas_src>

<mosaic_0001>
module attributes {stable_mosaic.version = 11 : i64} {
  func.func @_layernorm_kernel(%arg0: i32, %arg1: i32, %arg2: memref<1x4x256xf32, #tpu.memory_space<vmem>>, %arg3: memref<1x4x1xf32, #tpu.memory_space<vmem>>, %arg4: memref<1x4x256xf32, #tpu.memory_space<vmem>>) attributes {dimension_semantics = [#tpu.dimension_semantics<parallel>, #tpu.dimension_semantics<parallel>], iteration_bounds = array<i64: 2, 1>, scalar_prefetch = 0 : i64, scratch_operands = 0 : i64, tpu.core_type = #tpu.core_type<tc>, window_params = [{transform_indices = @transform_0, window_bounds = array<i64: 1, 4, 256>}, {pipeline_mode = #tpu.pipeline_mode<synchronous>, transform_indices = @transform_1, window_bounds = array<i64: 1, 4, 1>}, {transform_indices = @transform_2, window_bounds = array<i64: 1, 4, 256>}]} {
    %c0 = arith.constant 0 : index
    %c0_0 = arith.constant 0 : index
    %c0_1 = arith.constant 0 : index
    %0 = vector.load %arg2[%c0, %c0_0, %c0_1] : memref<1x4x256xf32, #tpu.memory_space<vmem>>, vector<1x4x256xf32>
    %cst = arith.constant dense<0.000000e+00> : vector<1x256xf32>
    %1 = vector.multi_reduction <add>, %0, %cst [1] : vector<1x4x256xf32> to vector<1x256xf32>
    %2 = vector.shape_cast %1 : vector<1x256xf32> to vector<1x1x256xf32>
    %cst_2 = arith.constant 2.500000e-01 : f32
    %3 = vector.broadcast %cst_2 : f32 to vector<1x1x256xf32>
    %4 = arith.mulf %2, %3 : vector<1x1x256xf32>
    %5 = vector.broadcast %4 : vector<1x1x256xf32> to vector<1x4x256xf32>
    %6 = arith.subf %0, %5 : vector<1x4x256xf32>
    %7 = arith.mulf %6, %6 : vector<1x4x256xf32>
    %cst_3 = arith.constant dense<0.000000e+00> : vector<1x256xf32>
    %8 = vector.multi_reduction <add>, %7, %cst_3 [1] : vector<1x4x256xf32> to vector<1x256xf32>
    %9 = vector.shape_cast %8 : vector<1x256xf32> to vector<1x1x256xf32>
    %cst_4 = arith.constant 2.500000e-01 : f32
    %10 = vector.broadcast %cst_4 : f32 to vector<1x1x256xf32>
    %11 = arith.mulf %9, %10 : vector<1x1x256xf32>
    %cst_5 = arith.constant 9.99999974E-6 : f32
    %12 = vector.broadcast %cst_5 : f32 to vector<1x1x256xf32>
    %13 = arith.addf %11, %12 : vector<1x1x256xf32>
    %14 = math.rsqrt %13 : vector<1x1x256xf32>
    %15 = vector.broadcast %14 : vector<1x1x256xf32> to vector<1x4x256xf32>
    %16 = arith.mulf %6, %15 : vector<1x4x256xf32>
    %c0_6 = arith.constant 0 : index
    %c0_7 = arith.constant 0 : index
    %c0_8 = arith.constant 0 : index
    %17 = vector.load %arg3[%c0_6, %c0_7, %c0_8] : memref<1x4x1xf32, #tpu.memory_space<vmem>>, vector<1x4x1xf32>
    %18 = vector.broadcast %17 : vector<1x4x1xf32> to vector<1x4x256xf32>
    %19 = arith.mulf %16, %18 : vector<1x4x256xf32>
    %c0_9 = arith.constant 0 : index
    %c0_10 = arith.constant 0 : index
    %c0_11 = arith.constant 0 : index
    %20 = vector.load %arg4[%c0_9, %c0_10, %c0_11] : memref<1x4x256xf32, #tpu.memory_space<vmem>>, vector<1x4x256xf32>
    tpu.vector_store %arg4[%c0_9, %c0_10, %c0_11], %19 {strides = array<i32>} : memref<1x4x256xf32, #tpu.memory_space<vmem>>, vector<1x4x256xf32>,
    return
  }
  func.func @transform_0(%arg0: i32, %arg1: i32) -> (i32, i32, i32) {
    %c0_i32 = arith.constant 0 : i32
    %c0_i32_0 = arith.constant 0 : i32
    return %arg0, %c0_i32, %arg1 : i32, i32, i32
  }
  func.func @transform_1(%arg0: i32, %arg1: i32) -> (i32, i32, i32) {
    %c0_i32 = arith.constant 0 : i32
    %c0_i32_0 = arith.constant 0 : i32
    %c0_i32_1 = arith.constant 0 : i32
    %c0_i32_2 = arith.constant 0 : i32
    return %c0_i32, %c0_i32_0, %c0_i32_1 : i32, i32, i32
  }
  func.func @transform_2(%arg0: i32, %arg1: i32) -> (i32, i32, i32) {
    %c0_i32 = arith.constant 0 : i32
    %c0_i32_0 = arith.constant 0 : i32
    return %arg0, %c0_i32, %arg1 : i32, i32, i32
  }
}

</mosaic_0001>

<bundles_post_ra>
// kernel: tpu_custom_call.1
= control target key start
LH: loop header
LB: loop body
LE: loop exit
PB: predicated region body
PF: predicated region fallthrough
CT: control target
= control target key end

     0   :  { %7 = vsyncpa [#allocation3], 0  ;;  %s754_s0 = inlined_call_operand.hbm [shape: f32[2,4,256], index: 0, kind: input, shape index: {}]   ;;  %s755_s1 = inlined_call_operand.vmem [shape: f32[1,4,1], index: 1, kind: input, shape index: {}]   ;;  %s756_s2 = inlined_call_operand.hbm [shape: f32[2,4,256], index: 2, kind: output, shape index: {}]  }
   0x1   :  { %9 = vsyncpa [#allocation3 + $0x1], 0 }
   0x2   :  { %10 = vsyncpa [#allocation4], 0 }
   0x3   :  { %12 = vsyncpa [#allocation4 + $0x1], 0  ;;  %s571_s9 = smov 0   ;;  %s573_s10 = smov 0  }
   0x4   :  { %s575_s11 = smov 0   ;;  %s577_s12 = smov 0  }
   0x5   :  { %s579_s13 = smov 0   ;;  %s581_s14 = smov 0  }
   0x6 LB: > { %s351_s15 = sadd.s32 4294967295, %s550_s14   ;;  %s352_s16 = sadd.s32 4294967294, %s550_s14   ;;  %s550_s14 = sphi %s581_s14, %s18_s14   ;;  %s546_s13 = sphi %s579_s13, %s772_s13   ;;  %s542_s12 = sphi %s577_s12, %s771_s12   ;;  %s538_s11 = sphi %s575_s11, %s770_s11   ;;  %s534_s10 = sphi %s573_s10, %s769_s10   ;;  %s530_s9 = sphi %s571_s9, %s768_s9  }
   0x7   : > { %s30_s17 = sadd.s32 1, %s546_s13  ;;  %s39_s18 = sadd.s32 1, %s538_s11 }
   0x8   : > { %p32_p0 = scmp.ge.s32.totalorder %s30_s17, 2  ;;  %p46_p1 = scmp.ne.s32.totalorder %s538_s11, %s534_s10 }
   0x9   : > { %p47_p2 = scmp.eq.s32.totalorder %s550_s14, 0  ;;  %p52_p3 = scmp.ne.s32.totalorder %s534_s10, %s530_s9 }
   0xa   : > { %s774_s17 = smov (%p32_p0, %s30_s17), 0  ;;  %p53_p5 = scmp.eq.s32.totalorder %s351_s15, 0 }
   0xb   : > { %p612_p4 = por %p47_p2, %p46_p1  ;;  %s34_s20 = ssub.s32 %s546_s13, %s774_s17 }
   0xc   : > { %p99_p6 = scmp.eq.s32.totalorder %s351_s15, 1  ;;  %p37_p7 = scmp.eq.s32.totalorder %s34_s20, 0 }
   0xd   : > { %p618_p8 = por %p53_p5, %p52_p3  ;;  %p105_p10 = scmp.eq.s32.totalorder %s352_s16, 1 }
   0xe   : > { %p622_p9 = por %p99_p6, %p46_p1  ;;  %p380_p13 = scmp.lt.s32.totalorder %s550_s14, 2 }
   0xf   : > { %s627_s23 = scalar_select %p37_p7, %s538_s11, %s39_s18  }
  0x10   : > { %s760_s22 = scalar_select %p622_p9, 1, 0 }
  0x11   : > { %p629_p11 = por %p105_p10, %p52_p3  ;;  %s128_s25 = sand.u32 1, %s538_s11  }
  0x12   : > { %s355_s26 = sshll.u32 %s128_s25, 3  ;;  %s366_s27 = sshll.u32 %s546_s13, 7 }
  0x13   : > { %s761_s24 = scalar_select %p629_p11, 1, 0 }
  0x14   : > { %s640_s30 = scalar_lea.hbm %s754_s0, %s366_s27  ;;  %s132_s3 = scalar_lea.vmem [#allocation2], %s355_s26 }
  0x15   : > { %s142_s4 = sshll.u32 %s132_s3, 4  ;;  %p646_p0 = pnand %p380_p13, %p612_p4  ;;  %s642_s4 = int_to_ptr.vmem [resolvable:$true] %s142_s4 }
  0x16   : > { %s129_s6 = scalar_lea.sflag [#allocation3], %s128_s25  ;;  %s438_s7 = scalar_lea.hbm %s640_s30, 128 }
  0x17   : > { %p439_p3 = scmp.ne.s32.totalorder %s640_s30, %s438_s7  ;;  %p440_p5 = pneg %p646_p0 }
  0x18   : > { %s443_s16 = scalar_lea.hbm %s754_s0, 256  ;;  %p444_p4 = scmp.lt.u32.totalorder %s640_s30, %s754_s0 }
  0x19   : > { %p441_p6 = pnand %p440_p5, %p439_p3  ;;  %p445_p10 = scmp.lt.u32.totalorder %s443_s16, %s438_s7 }
  0x1a   : > { %p447_p12 = scmp.lt.u32.totalorder %s438_s7, %s640_s30 }
  0x1b   : > { %p442_p7 = pneg %p441_p6  ;;  %p446_p13 = por %p445_p10, %p444_p4 }
  0x1d   : > { %p448_p1 = por %p447_p12, %p446_p13 }
  0x1f   : > { %p449_p2 = pnand %p448_p1, %p442_p7 }
  0x21   : > { %452 = shalt.err (!%p449_p2)
}
  0x22   : > { %s453_s20 = scalar_lea.vmem %s642_s4, 128  ;;  %s552_s25 = smov [#allocation2]  }
  0x23   : > { %p454_p3 = scmp.ne.s32.totalorder %s642_s4, %s453_s20  ;;  %s458_s26 = sshll.u32 %s552_s25, 4  ;;  %s459_s26 = int_to_ptr.vmem [resolvable:$false] %s458_s26 }
  0x24   : > { %s460_s27 = scalar_lea.vmem %s459_s26, 256  ;;  %p461_p9 = scmp.lt.s32.totalorder %s642_s4, %s459_s26 }
  0x25   : > { %p456_p6 = pnand %p454_p3, %p440_p5  ;;  %p462_p4 = scmp.lt.s32.totalorder %s460_s27, %s453_s20 }
  0x27   : > { %p457_p11 = pneg %p456_p6  ;;  %p463_p10 = por %p462_p4, %p461_p9 }
  0x29   : > { %p464_p12 = pnand %p463_p10, %p457_p11 }
  0x2b   : > { %467 = shalt.err (!%p464_p12)
}
  0x2c   : > { %375 = dma.hbm_to_vmem [thread:$0]  (!%p646_p0), %s640_s30, 128, %s642_s4, %s129_s6  }
  0x2d   : > { %p763_p1 = scmp.lt.s32.totalorder %s550_s14, 3  ;;  %p764_p2 = scmp.ge.s32.totalorder %s550_s14, 1 }
  0x2f   : > { %p148_p5 = pnand %p764_p2, %p763_p1 }
  0x30   : > { %s682_s28 = sand.u32 (!%p148_p5), 1, %s534_s10  }
  0x31   : > { %151 = sbr.rel (%p148_p5) target bundleno = 205 (0xcd), region = 28  ;;  %s359_s29 = sshll.u32 (!%p148_p5), %s682_s28, 3 }
  0x32   : > { %s154_s3 = scalar_lea.sflag (!%p148_p5), [#allocation3], %s682_s28  ;;  %s157_s5 = scalar_lea.vmem (!%p148_p5), [#allocation2], %s359_s29 }
  0x38   : > { %521 = dma.done.wait (%p618_p8), %s154_s3, 128  }
  0x39   : > { %523 = vsyncadd (%p618_p8), %s154_s3, 4294967168  ;;  %v553_v0 = vmov 0   ;;  %v235_v1 = vld [vmem:[%s755_s1] sm:$0xf]  ;;  %vm184_vm0 = vcmask 1043456   ;;  %v243_v44 = vlaneseq  ;;  %s367_s21 = sshll.u32 %s542_s12, 7 }
  0x3a   : > { %432 = vset.pattern.permute.xlu0 %v553_v0  ;;  %v180_v2 = vld [vmem:[%s157_s5] sm:$0xff]  ;;  %v554_v42 = vmov 839922192   ;;  %s177_s6 = scalar_lea.vmem [#allocation5], %s359_s29  ;;  %s705_s16 = scalar_lea.hbm %s756_s2, %s367_s21 }
  0x3b   : > { %238 = vperm.xlu0 %432, %v235_v1   ;;  %v182_v3 = vcombine.high %v180_v2, %v180_v2  ;;  %v185_v4 = vsel %vm184_vm0, %v180_v2, 0.0  ;;  %v241_v43 = vunpack.c.l.s4 %v554_v42  ;;  %v244_v48 = vshrl.u32 %v243_v44, 7  ;;  %s267_s7 = sshll.u32 %s177_s6, 4  ;;  %s251_s18 = scalar_lea.sflag [#allocation4], %s682_s28  ;;  %s707_s7 = int_to_ptr.vmem [resolvable:$true] %s267_s7 }
  0x3c   : > { %v186_v6 = vrot.slane %v185_v4, 4  ;;  %s468_s19 = scalar_lea.vmem %s707_s7, 128  ;;  %p765_p9 = scmp.ne.s32.totalorder %s760_s22, 0 }
  0x3d   : > { %v192_v5 = vsel %vm184_vm0, %v182_v3, 0.0  ;;  %v242_v47 = vunpack.c.0.s8 %v241_v43  ;;  %p469_p8 = scmp.ne.s32.totalorder %s707_s7, %s468_s19  ;;  %s555_s12 = smov [#allocation5]  }
  0x3e   : > { %v193_v7 = vrot.slane %v192_v5, 4  ;;  %v187_v8 = vadd.f32 %v186_v6, %v185_v4  ;;  %s472_s20 = sshll.u32 %s555_s12, 4  ;;  %s473_s20 = int_to_ptr.vmem [resolvable:$false] %s472_s20 }
  0x3f   : > { %v245_v50 = vsub.s32 %v242_v47, %v244_v48  ;;  %p470_p11 = pnand %p469_p8, %p765_p9  ;;  %s474_s25 = scalar_lea.vmem %s473_s20, 256 }
  0x40   : > { %v194_v9 = vadd.f32 %v193_v7, %v192_v5  ;;  %v188_v10 = vrot.slane %v187_v8, 2  ;;  %p475_p7 = scmp.lt.s32.totalorder %s707_s7, %s473_s20  ;;  %p476_p13 = scmp.lt.s32.totalorder %s474_s25, %s468_s19 }
  0x41   : > { %p471_p0 = pneg %p470_p11 }
  0x42   : > { %v195_v11 = vrot.slane %v194_v9, 2  ;;  %v189_v12 = vadd.f32 %v188_v10, %v187_v8  ;;  %p477_p3 = por %p476_p13, %p475_p7 }
  0x44   : > { %v196_v13 = vadd.f32 %v195_v11, %v194_v9  ;;  %v190_v14 = vrot.slane %v189_v12, 1  ;;  %p478_p6 = pnand %p477_p3, %p471_p0 }
  0x46   : > { %v197_v15 = vrot.slane %v196_v13, 1  ;;  %v191_v16 = vadd.f32 %v190_v14, %v189_v12 }
  0x48   : > { %v198_v17 = vadd.f32 %v197_v15, %v196_v13  ;;  %v199_v18 = vmul.f32 0.25, %v191_v16 }
  0x4a   : > { %v200_v19 = vmul.f32 0.25, %v198_v17 }
  0x4c   : > { %v203_v20 = vcombine.low %v199_v18, %v200_v19 }
  0x4e   : > { %v205_v21 = vsub.f32 %v180_v2, %v203_v20 }
  0x50   : > { %v206_v22 = vmul.f32 %v205_v21, %v205_v21 }
  0x52   : > { %v208_v23 = vcombine.high %v206_v22, %v206_v22  ;;  %v210_v24 = vsel %vm184_vm0, %v206_v22, 0.0 }
  0x53   : > { %v211_v26 = vrot.slane %v210_v24, 4 }
  0x54   : > { %v217_v25 = vsel %vm184_vm0, %v208_v23, 0.0 }
  0x55   : > { %v218_v27 = vrot.slane %v217_v25, 4  ;;  %v212_v28 = vadd.f32 %v211_v26, %v210_v24 }
  0x57   : > { %v219_v29 = vadd.f32 %v218_v27, %v217_v25  ;;  %v213_v30 = vrot.slane %v212_v28, 2 }
  0x59   : > { %v220_v31 = vrot.slane %v219_v29, 2  ;;  %v214_v32 = vadd.f32 %v213_v30, %v212_v28 }
  0x5b   : > { %v221_v33 = vadd.f32 %v220_v31, %v219_v29  ;;  %v215_v34 = vrot.slane %v214_v32, 1 }
  0x5d   : > { %v222_v35 = vrot.slane %v221_v33, 1  ;;  %v216_v36 = vadd.f32 %v215_v34, %v214_v32 }
  0x5f   : > { %v223_v37 = vadd.f32 %v222_v35, %v221_v33  ;;  %v224_v38 = vmul.f32 0.25, %v216_v36 }
  0x61   : > { %v225_v39 = vmul.f32 0.25, %v223_v37  ;;  %v226_v40 = vadd.f32 1e-05, %v224_v38 }
  0x63   : > { %v227_v41 = vadd.f32 1e-05, %v225_v39  ;;  %434 = vrsqrt.f32 %v226_v40 }
  0x65   : > { %436 = vrsqrt.f32 %v227_v41 }
  0x6d   : > { %v435_v45 = vpop.eup %434 }
  0x6f   : > { %v437_v46 = vpop.eup %436 }
  0x70   : > { %v232_v49 = vcombine.low %v435_v45, %v437_v46 }
  0x72   : > { %v234_v51 = vmul.f32 %v232_v49, %v205_v21 }
  0xba   : > { %v239_v52 = vpop.permute.xlu0 %238 }
  0xbb   : > { %v246_v53 = vrot.slane %v239_v52, %v245_v50 }
  0xbd   : > { %v248_v54 = vmul.f32 %v246_v53, %v234_v51 }
  0xbf   : > { %249 = vst [vmem:[%s177_s6] sm:$0xff] %v248_v54 }
  0xc0   : > { %481 = shalt.err (!%p478_p6)
}
  0xc1   : > { %s482_s26 = scalar_lea.hbm %s705_s16, 128  ;;  %s486_s29 = scalar_lea.hbm %s756_s2, 256 }
  0xc2   : > { %p483_p4 = scmp.ne.s32.totalorder %s705_s16, %s482_s26  ;;  %p487_p1 = scmp.lt.u32.totalorder %s705_s16, %s756_s2 }
  0xc3   : > { %p488_p2 = scmp.lt.u32.totalorder %s486_s29, %s482_s26  ;;  %p490_p8 = scmp.lt.u32.totalorder %s482_s26, %s705_s16 }
  0xc4   : > { %p484_p10 = pnand %p483_p4, %p765_p9 }
  0xc5   : > { %p489_p5 = por %p488_p2, %p487_p1 }
  0xc6   : > { %p485_p12 = pneg %p484_p10 }
  0xc7   : > { %p491_p11 = por %p490_p8, %p489_p5 }
  0xc9   : > { %p492_p0 = pnand %p491_p11, %p485_p12 }
  0xcb   : > { %495 = shalt.err (!%p492_p0)
}
  0xcc   : > { %370 = dma.vmem_to_hbm [thread:$0]  (%p765_p9), %s707_s7, 128, %s705_s16, %s251_s18  }
  0xcd PF: > { %s279_s30 = sand.u32 1, %s530_s9   ;;  %p766_p7 = scmp.ne.s32.totalorder %s761_s24, 0 }
  0xce   : > { %p767_p13 = scmp.ge.s32.totalorder %s550_s14, 2  ;;  %s280_s4 = scalar_lea.sflag [#allocation4], %s279_s30 }
  0xd0   : > { %p377_p3 = pnand %p767_p13, %p766_p7 }
  0xd2   : > { %525 = dma.done.wait (!%p377_p3), %s280_s4, 128  }
  0xd3   : > { %527 = vsyncadd (!%p377_p3), %s280_s4, 4294967168  ;;  %s18_s14 = sadd.s32 1, %s550_s14   ;;  %s768_s9 = smov %s534_s10 }
  0xd4   : > { %p15_p6 = scmp.ge.s32.totalorder %s18_s14, 4   ;;  %s769_s10 = smov %s538_s11 }
  0xd5   : > { %s770_s11 = smov %s627_s23  ;;  %s771_s12 = smov %s546_s13 }
  0xd6   : > { %s772_s13 = smov %s774_s17  ;;  %17 = sbr.rel (!%p15_p6) target bundleno = 6 (0x6), region = 73 }
  0xdd   :  { %285 = vsyncpa [#allocation3], 1 }
  0xde   :  { %287 = vsyncpa [#allocation3 + $0x1], 1 }
  0xdf   :  { %288 = vsyncpa [#allocation4], 1 }
  0xe0   :  { %290 = vsyncpa [#allocation4 + $0x1], 1 }

</bundles_post_ra>
